<compile_context>
chip_gen: v5e
topology: v5e:2x2
jax: 0.10.0
libtpu: 0.0.40
codegen_flags: <defaults>
</compile_context>

<pallas_src>
import jax
import jax.numpy as jnp
from jax.experimental import pallas as pl
from jax.experimental.pallas import tpu as pltpu


def _stsb_kernel(x_ref, m_ref, score_ref, w_ref, b_ref, sim_ref, sqerr_ref):
    """One batch tile of the STS-B head.

    x_ref:     (2, TB, S, Hin) bf16  -- sentence-1 / sentence-2 token embeddings
    m_ref:     (2, TB, S)      f32   -- attention masks
    score_ref: (TB, 1)         f32   -- gold similarity scores
    w_ref:     (Hin, Hp)       bf16  -- synthetic body projection (Hp = H padded to 128)
    b_ref:     (1, Hp)         f32
    sim_ref:   (TB, 1)         f32   -- cosine similarity output
    sqerr_ref: (TB, 1)         f32   -- per-sample (sim - score)^2
    """
    _, TB, S, Hin = x_ref.shape
    Hp = w_ref.shape[1]

    # ---- synthetic encoder body: tanh(x @ W + b), fused over both sentences ----
    # S % 8 == 0 (wrapper pads), so this reshape is a pure view.
    x = x_ref[...].reshape(2 * TB * S, Hin)                       # bf16
    h = jnp.dot(x, w_ref[...], preferred_element_type=jnp.float32) + b_ref[...]
    tok = jnp.tanh(h).reshape(2, TB, S, Hp)                       # f32

    # ---- masked mean pooling + L2 normalize (both sentences at once) ----------
    m = m_ref[...]                                                # (2, TB, S) f32
    sum_emb = jnp.sum(tok * m[..., None], axis=2)                 # (2, TB, Hp)
    sum_mask = jnp.sum(m, axis=2, keepdims=True)                  # (2, TB, 1)
    inv_mask = pl.reciprocal(jnp.maximum(sum_mask, 1e-9), approx=True)
    sent = sum_emb * inv_mask                                     # mean-pooled
    norm = jnp.sqrt(jnp.sum(sent * sent, axis=-1, keepdims=True))
    sent = sent * pl.reciprocal(jnp.maximum(norm, 1e-12), approx=True)  # F.normalize

    # ---- cosine similarity + per-sample squared error -------------------------
    u = sent[0]                                                   # (TB, Hp)
    v = sent[1]
    dot_uv = jnp.sum(u * v, axis=-1, keepdims=True)               # (TB, 1)
    nu = jnp.maximum(jnp.sqrt(jnp.sum(u * u, axis=-1, keepdims=True)), 1e-8)
    nv = jnp.maximum(jnp.sqrt(jnp.sum(v * v, axis=-1, keepdims=True)), 1e-8)
    sim = dot_uv * pl.reciprocal(nu * nv, approx=True)

    sim_ref[...] = sim
    diff = sim - score_ref[...]
    sqerr_ref[...] = diff * diff


def stsb_forward(emb1, mask1, emb2, mask2, score, W, b, *, tb=8):
    """Returns (Headloss, sim) exactly like STSBTrainingModel.forward."""
    B, S, Hin = emb1.shape
    H = W.shape[1]
    Bp = pl.cdiv(B, tb) * tb          # batch padded to the tile size
    Sp = pl.cdiv(S, 8) * 8            # sequence padded to sublane multiple
    Hp = pl.cdiv(H, 128) * 128        # hidden padded to lane multiple (exact: tanh(0)=0)

    def pad_emb(e):
        return jnp.pad(e, ((0, Bp - B), (0, Sp - S), (0, 0)))

    def pad_mask(m):
        return jnp.pad(m.astype(jnp.float32), ((0, Bp - B), (0, Sp - S)))

    # Stack the two sentences so the kernel runs one fused matmul per tile.
    x = jnp.stack([pad_emb(emb1), pad_emb(emb2)], axis=0).astype(jnp.bfloat16)
    m = jnp.stack([pad_mask(mask1), pad_mask(mask2)], axis=0)
    Wp = jnp.pad(W, ((0, 0), (0, Hp - H))).astype(jnp.bfloat16)
    bp = jnp.pad(b.reshape(1, -1).astype(jnp.float32), ((0, 0), (0, Hp - H)))
    sc = jnp.pad(score.reshape(-1).astype(jnp.float32), (0, Bp - B)).reshape(Bp, 1)

    grid = (Bp // tb,)
    sim_p, sqerr_p = pl.pallas_call(
        _stsb_kernel,
        out_shape=(jax.ShapeDtypeStruct((Bp, 1), jnp.float32),
                   jax.ShapeDtypeStruct((Bp, 1), jnp.float32)),
        grid_spec=pltpu.PrefetchScalarGridSpec(
            num_scalar_prefetch=0,
            grid=grid,
            in_specs=[
                pl.BlockSpec((2, tb, Sp, Hin), lambda i: (0, i, 0, 0)),   # x (bf16)
                pl.BlockSpec((2, tb, Sp), lambda i: (0, i, 0)),           # masks
                pl.BlockSpec((tb, 1), lambda i: (i, 0)),                  # score
                pl.BlockSpec((Hin, Hp), lambda i: (0, 0)),                # W (resident)
                pl.BlockSpec((1, Hp), lambda i: (0, 0)),                  # b (resident)
            ],
            out_specs=(pl.BlockSpec((tb, 1), lambda i: (i, 0)),           # sim
                       pl.BlockSpec((tb, 1), lambda i: (i, 0))),          # sq error
        ),
        compiler_params=pltpu.CompilerParams(
            dimension_semantics=("parallel",),         # megacore-shardable on v7x
            vmem_limit_bytes=32 * 1024 * 1024,         # safe on v7x's 64 MiB VMEM
        ),
    )(x, m, sc, Wp, bp)

    sim = sim_p[:B, 0]
    # Padded batch rows produce exactly 0 squared error, so sum/B == nn.MSELoss mean.
    head_loss = jnp.sum(sqerr_p) / B
    return head_loss, sim


if __name__ == "__main__":
    # Small deterministic setup: batch=2, seq=8, embed_in=16, hidden=32, vocab=50
    B, S, Hin, H, V = 2, 8, 16, 32, 50
    key = jax.random.PRNGKey(0)
    k_emb, k_w, k_b, k_ids1, k_ids2, k_score = jax.random.split(key, 6)

    # Deterministic synthetic "body" parameters.
    embed_table = jax.random.normal(k_emb, (V, Hin), jnp.float32) * 0.1
    W = jax.random.normal(k_w, (Hin, H), jnp.float32) * (1.0 / jnp.sqrt(Hin))
    b = jax.random.normal(k_b, (H,), jnp.float32) * 0.01

    # Inputs (same role as input_ids1/2, attention_mask1/2, score).
    input_ids1 = jax.random.randint(k_ids1, (B, S), 0, V)
    input_ids2 = jax.random.randint(k_ids2, (B, S), 0, V)
    attention_mask1 = jnp.array([[1, 1, 1, 1, 1, 1, 0, 0],
                                 [1, 1, 1, 1, 0, 0, 0, 0]], jnp.float32)
    attention_mask2 = jnp.array([[1, 1, 1, 1, 1, 0, 0, 0],
                                 [1, 1, 1, 1, 1, 1, 1, 1]], jnp.float32)
    score = jax.random.uniform(k_score, (B,), jnp.float32, 0.0, 5.0)

    # Embedding lookup is parameter-setup glue (gather) done in plain JAX.
    emb1 = embed_table[input_ids1]   # (B, S, Hin)
    emb2 = embed_table[input_ids2]   # (B, S, Hin)

    fwd = jax.jit(stsb_forward)
    head_loss, sim = fwd(emb1, attention_mask1, emb2, attention_mask2, score, W, b)
    jax.block_until_ready((head_loss, sim))
    print("KERNEL_OK")
</pallas_src>

<mosaic_0001>
module attributes {stable_mosaic.version = 11 : i64} {
  func.func @_stsb_kernel(%arg0: i32, %arg1: memref<2x8x8x16xbf16, #tpu.memory_space<vmem>>, %arg2: memref<2x8x8xf32, #tpu.memory_space<vmem>>, %arg3: memref<8x1xf32, #tpu.memory_space<vmem>>, %arg4: memref<16x128xbf16, #tpu.memory_space<vmem>>, %arg5: memref<1x128xf32, #tpu.memory_space<vmem>>, %arg6: memref<8x1xf32, #tpu.memory_space<vmem>>, %arg7: memref<8x1xf32, #tpu.memory_space<vmem>>) attributes {dimension_semantics = [#tpu.dimension_semantics<parallel>], iteration_bounds = array<i64: 1>, scalar_prefetch = 0 : i64, scratch_operands = 0 : i64, tpu.core_type = #tpu.core_type<tc>, window_params = [{transform_indices = @transform_0, window_bounds = array<i64: 2, 8, 8, 16>}, {transform_indices = @transform_1, window_bounds = array<i64: 2, 8, 8>}, {transform_indices = @transform_2, window_bounds = array<i64: 8, 1>}, {pipeline_mode = #tpu.pipeline_mode<synchronous>, transform_indices = @transform_3, window_bounds = array<i64: 16, 128>}, {pipeline_mode = #tpu.pipeline_mode<synchronous>, transform_indices = @transform_4, window_bounds = array<i64: 1, 128>}, {transform_indices = @transform_5, window_bounds = array<i64: 8, 1>}, {transform_indices = @transform_6, window_bounds = array<i64: 8, 1>}]} {
    %c0 = arith.constant 0 : index
    %c0_0 = arith.constant 0 : index
    %c0_1 = arith.constant 0 : index
    %c0_2 = arith.constant 0 : index
    %0 = vector.load %arg1[%c0, %c0_0, %c0_1, %c0_2] : memref<2x8x8x16xbf16, #tpu.memory_space<vmem>>, vector<2x8x8x16xbf16>
    %1 = vector.shape_cast %0 : vector<2x8x8x16xbf16> to vector<128x16xbf16>
    %c0_3 = arith.constant 0 : index
    %c0_4 = arith.constant 0 : index
    %2 = vector.load %arg4[%c0_3, %c0_4] : memref<16x128xbf16, #tpu.memory_space<vmem>>, vector<16x128xbf16>
    %cst = arith.constant dense<0.000000e+00> : vector<128x128xf32>
    %3 = tpu.matmul %1, %2, %cst {dimension_numbers = #tpu.dot_dimension_numbers<[1], [0], [0], [1], [0, 0, 1, 1], [], []>} : vector<128x16xbf16>, vector<16x128xbf16>, vector<128x128xf32> -> vector<128x128xf32>
    %c0_5 = arith.constant 0 : index
    %c0_6 = arith.constant 0 : index
    %4 = vector.load %arg5[%c0_5, %c0_6] : memref<1x128xf32, #tpu.memory_space<vmem>>, vector<1x128xf32>
    %5 = vector.broadcast %4 : vector<1x128xf32> to vector<128x128xf32>
    %6 = arith.addf %3, %5 : vector<128x128xf32>
    %7 = math.tanh %6 : vector<128x128xf32>
    %8 = vector.shape_cast %7 : vector<128x128xf32> to vector<2x8x8x128xf32>
    %c0_7 = arith.constant 0 : index
    %c0_8 = arith.constant 0 : index
    %c0_9 = arith.constant 0 : index
    %9 = vector.load %arg2[%c0_7, %c0_8, %c0_9] : memref<2x8x8xf32, #tpu.memory_space<vmem>>, vector<2x8x8xf32>
    %10 = vector.shape_cast %9 : vector<2x8x8xf32> to vector<2x8x8x1xf32>
    %11 = vector.broadcast %10 : vector<2x8x8x1xf32> to vector<2x8x8x128xf32>
    %12 = arith.mulf %8, %11 : vector<2x8x8x128xf32>
    %cst_10 = arith.constant dense<0.000000e+00> : vector<2x8x128xf32>
    %13 = vector.multi_reduction <add>, %12, %cst_10 [2] : vector<2x8x8x128xf32> to vector<2x8x128xf32>
    %cst_11 = arith.constant dense<0.000000e+00> : vector<2x8xf32>
    %14 = vector.multi_reduction <add>, %9, %cst_11 [2] : vector<2x8x8xf32> to vector<2x8xf32>
    %15 = vector.shape_cast %14 : vector<2x8xf32> to vector<2x8x1xf32>
    %cst_12 = arith.constant 9.99999971E-10 : f32
    %16 = vector.broadcast %cst_12 : f32 to vector<2x8x1xf32>
    %17 = arith.maximumf %15, %16 : vector<2x8x1xf32>
    %18 = tpu.reciprocal %17 {approx = true} : vector<2x8x1xf32> -> vector<2x8x1xf32>
    %19 = vector.broadcast %18 : vector<2x8x1xf32> to vector<2x8x128xf32>
    %20 = arith.mulf %13, %19 : vector<2x8x128xf32>
    %21 = arith.mulf %20, %20 : vector<2x8x128xf32>
    %cst_13 = arith.constant dense<0.000000e+00> : vector<2x8xf32>
    %22 = vector.multi_reduction <add>, %21, %cst_13 [2] : vector<2x8x128xf32> to vector<2x8xf32>
    %23 = vector.shape_cast %22 : vector<2x8xf32> to vector<2x8x1xf32>
    %24 = math.sqrt %23 : vector<2x8x1xf32>
    %cst_14 = arith.constant 9.99999996E-13 : f32
    %25 = vector.broadcast %cst_14 : f32 to vector<2x8x1xf32>
    %26 = arith.maximumf %24, %25 : vector<2x8x1xf32>
    %27 = tpu.reciprocal %26 {approx = true} : vector<2x8x1xf32> -> vector<2x8x1xf32>
    %28 = vector.broadcast %27 : vector<2x8x1xf32> to vector<2x8x128xf32>
    %29 = arith.mulf %20, %28 : vector<2x8x128xf32>
    %30 = vector.extract_strided_slice %29 {offsets = [0, 0, 0], sizes = [1, 8, 128], strides = [1, 1, 1]} : vector<2x8x128xf32> to vector<1x8x128xf32>
    %31 = vector.shape_cast %30 : vector<1x8x128xf32> to vector<8x128xf32>
    %32 = vector.extract_strided_slice %29 {offsets = [1, 0, 0], sizes = [1, 8, 128], strides = [1, 1, 1]} : vector<2x8x128xf32> to vector<1x8x128xf32>
    %33 = vector.shape_cast %32 : vector<1x8x128xf32> to vector<8x128xf32>
    %34 = arith.mulf %31, %33 : vector<8x128xf32>
    %cst_15 = arith.constant dense<0.000000e+00> : vector<8xf32>
    %35 = vector.multi_reduction <add>, %34, %cst_15 [1] : vector<8x128xf32> to vector<8xf32>
    %36 = vector.shape_cast %35 : vector<8xf32> to vector<8x1xf32>
    %37 = arith.mulf %31, %31 : vector<8x128xf32>
    %cst_16 = arith.constant dense<0.000000e+00> : vector<8xf32>
    %38 = vector.multi_reduction <add>, %37, %cst_16 [1] : vector<8x128xf32> to vector<8xf32>
    %39 = vector.shape_cast %38 : vector<8xf32> to vector<8x1xf32>
    %40 = math.sqrt %39 : vector<8x1xf32>
    %cst_17 = arith.constant 9.99999993E-9 : f32
    %41 = vector.broadcast %cst_17 : f32 to vector<8x1xf32>
    %42 = arith.maximumf %40, %41 : vector<8x1xf32>
    %43 = arith.mulf %33, %33 : vector<8x128xf32>
    %cst_18 = arith.constant dense<0.000000e+00> : vector<8xf32>
    %44 = vector.multi_reduction <add>, %43, %cst_18 [1] : vector<8x128xf32> to vector<8xf32>
    %45 = vector.shape_cast %44 : vector<8xf32> to vector<8x1xf32>
    %46 = math.sqrt %45 : vector<8x1xf32>
    %cst_19 = arith.constant 9.99999993E-9 : f32
    %47 = vector.broadcast %cst_19 : f32 to vector<8x1xf32>
    %48 = arith.maximumf %46, %47 : vector<8x1xf32>
    %49 = arith.mulf %42, %48 : vector<8x1xf32>
    %50 = tpu.reciprocal %49 {approx = true} : vector<8x1xf32> -> vector<8x1xf32>
    %51 = arith.mulf %36, %50 : vector<8x1xf32>
    %c0_20 = arith.constant 0 : index
    %c0_21 = arith.constant 0 : index
    %52 = vector.load %arg6[%c0_20, %c0_21] : memref<8x1xf32, #tpu.memory_space<vmem>>, vector<8x1xf32>
    tpu.vector_store %arg6[%c0_20, %c0_21], %51 {strides = array<i32>} : memref<8x1xf32, #tpu.memory_space<vmem>>, vector<8x1xf32>,
    %c0_22 = arith.constant 0 : index
    %c0_23 = arith.constant 0 : index
    %53 = vector.load %arg3[%c0_22, %c0_23] : memref<8x1xf32, #tpu.memory_space<vmem>>, vector<8x1xf32>
    %54 = arith.subf %51, %53 : vector<8x1xf32>
    %55 = arith.mulf %54, %54 : vector<8x1xf32>
    %c0_24 = arith.constant 0 : index
    %c0_25 = arith.constant 0 : index
    %56 = vector.load %arg7[%c0_24, %c0_25] : memref<8x1xf32, #tpu.memory_space<vmem>>, vector<8x1xf32>
    tpu.vector_store %arg7[%c0_24, %c0_25], %55 {strides = array<i32>} : memref<8x1xf32, #tpu.memory_space<vmem>>, vector<8x1xf32>,
    return
  }
  func.func @transform_0(%arg0: i32) -> (i32, i32, i32, i32) {
    %c0_i32 = arith.constant 0 : i32
    %c0_i32_0 = arith.constant 0 : i32
    %c0_i32_1 = arith.constant 0 : i32
    %c0_i32_2 = arith.constant 0 : i32
    return %c0_i32, %arg0, %c0_i32_0, %c0_i32_1 : i32, i32, i32, i32
  }
  func.func @transform_1(%arg0: i32) -> (i32, i32, i32) {
    %c0_i32 = arith.constant 0 : i32
    %c0_i32_0 = arith.constant 0 : i32
    %c0_i32_1 = arith.constant 0 : i32
    return %c0_i32, %arg0, %c0_i32_0 : i32, i32, i32
  }
  func.func @transform_2(%arg0: i32) -> (i32, i32) {
    %c0_i32 = arith.constant 0 : i32
    %c0_i32_0 = arith.constant 0 : i32
    return %arg0, %c0_i32 : i32, i32
  }
  func.func @transform_3(%arg0: i32) -> (i32, i32) {
    %c0_i32 = arith.constant 0 : i32
    %c0_i32_0 = arith.constant 0 : i32
    %c0_i32_1 = arith.constant 0 : i32
    return %c0_i32, %c0_i32_0 : i32, i32
  }
  func.func @transform_4(%arg0: i32) -> (i32, i32) {
    %c0_i32 = arith.constant 0 : i32
    %c0_i32_0 = arith.constant 0 : i32
    %c0_i32_1 = arith.constant 0 : i32
    return %c0_i32, %c0_i32_0 : i32, i32
  }
  func.func @transform_5(%arg0: i32) -> (i32, i32) {
    %c0_i32 = arith.constant 0 : i32
    %c0_i32_0 = arith.constant 0 : i32
    return %arg0, %c0_i32 : i32, i32
  }
  func.func @transform_6(%arg0: i32) -> (i32, i32) {
    %c0_i32 = arith.constant 0 : i32
    %c0_i32_0 = arith.constant 0 : i32
    return %arg0, %c0_i32 : i32, i32
  }
}

</mosaic_0001>

<bundles_post_ra>
// kernel: stsb_forward.1
= control target key start
LH: loop header
LB: loop body
LE: loop exit
PB: predicated region body
PF: predicated region fallthrough
CT: control target
= control target key end

     0   :  { %vm407_vm0 = vcmask 64512   ;;  %v184_v0 = vlaneseq  ;;  %vm91_vm1 = vcmask 130048   ;;  %vm499_vm2 = vcmask 1041409   ;;  %s1182_s1 = inlined_call_operand.vmem [shape: f32[2,8,8], index: 1, kind: input, shape index: {}]   ;;  %s1183_s3 = inlined_call_operand.vmem [shape: bf16[16,128], index: 3, kind: input, shape index: {}]   ;;  %s1184_s0 = inlined_call_operand.vmem [shape: bf16[2,8,8,16], index: 0, kind: input, shape index: {}]   ;;  %s1185_s4 = inlined_call_operand.vmem [shape: f32[1,128], index: 4, kind: input, shape index: {}]   ;;  %s1186_s2 = inlined_call_operand.vmem [shape: f32[8,1], index: 2, kind: input, shape index: {}]   ;;  %s1187_s5 = inlined_call_operand.vmem [shape: f32[8,1], index: 5, kind: output, shape index: {0}]   ;;  %s1188_s6 = inlined_call_operand.vmem [shape: f32[8,1], index: 6, kind: output, shape index: {1}]  }
   0x1   :  { %v182_v1 = vld [vmem:[%s1182_s1 + $0x8] sm:$0xff]  ;;  %v809_v2 = vld [vmem:[%s1183_s3] sm:$0xff]  ;;  %v807_v8 = vld [vmem:[%s1184_s0 + $0x30] sm:$0xff]  ;;  %vm502_vm3 = vcmask 1042434   ;;  %vm505_vm4 = vcmask 1043459   ;;  %vm508_vm5 = vcmask 1044484  }
   0x2   :  { %v411_v3 = vsel %vm407_vm0, %v182_v1, 0.0  ;;  %v185_v4 = vshrl.u32 %v184_v0, 7  ;;  %v801_v5 = vld [vmem:[%s1184_s0] sm:$0xff]  ;;  %123 = vmatpush.bf16.msra.mxu0 %v809_v2  ;;  %811 = vmatpush.bf16.msra.mxu2 %v809_v2  ;;  %v803_v9 = vld [vmem:[%s1184_s0 + $0x10] sm:$0xff]  ;;  %v253_v12 = vperm.slane %v182_v1, 2  ;;  %v802_v13 = vld [vmem:[%s1184_s0 + $0x8] sm:$0xff] }
   0x3   :  { %412 = vadd.xlane.f32.xlu0 %v411_v3  ;;  %v805_v6 = vld [vmem:[%s1184_s0 + $0x20] sm:$0xff]  ;;  %812 = vmatpush.bf16.msra.mxu3 %v809_v2  ;;  %v806_v15 = vld [vmem:[%s1184_s0 + $0x28] sm:$0xff]  ;;  %v808_v16 = vld [vmem:[%s1184_s0 + $0x38] sm:$0xff]  ;;  %v260_v18 = vperm.slane %v182_v1, 3  ;;  %v246_v19 = vperm.slane %v182_v1, 1  ;;  %v239_v22 = vperm.slane %v182_v1, 0 }
   0x4   :  { %v181_v7 = vld [vmem:[%s1182_s1] sm:$0xff]  ;;  %813 = vset.pattern.permute.xlu1 %v185_v4  ;;  %810 = vmatpush.bf16.msra.mxu1 %v809_v2  ;;  %v804_v17 = vld [vmem:[%s1184_s0 + $0x18] sm:$0xff]  ;;  %v267_v24 = vperm.slane %v182_v1, 4  ;;  %v288_v25 = vperm.slane %v182_v1, 7  ;;  %v281_v26 = vperm.slane %v182_v1, 6  ;;  %v274_v28 = vperm.slane %v182_v1, 5 }
   0x5   :  { %v408_v10 = vsel %vm407_vm0, %v181_v7, 0.0  ;;  %793 = vmatmul.msk.bf16.vlgmr.msra.gmra.mxu0 %vm91_vm1, %v801_v5  ;;  %815 = vset.pattern.permute.xlu0 %v185_v4  ;;  %v197_v11 = vperm.slane %v181_v7, 2  ;;  %v190_v14 = vperm.slane %v181_v7, 1  ;;  %v183_v20 = vperm.slane %v181_v7, 0  ;;  %v950_v33 = vld [vmem:[%s1185_s4] ss:$0 sm:$0xff] }
   0x6   :  { %797 = vmatmul.msk.bf16.vlgmr.msra.gmra.mxu2 %vm91_vm1, %v805_v6  ;;  %409 = vadd.xlane.f32.xlu2 %v408_v10  ;;  %v211_v21 = vperm.slane %v181_v7, 4  ;;  %v204_v23 = vperm.slane %v181_v7, 3  ;;  %v218_v27 = vperm.slane %v181_v7, 5  ;;  %v225_v29 = vperm.slane %v181_v7, 6 }
   0x7   :  { %799 = vmatmul.msk.bf16.vlgmr.msra.gmra.mxu3 %vm91_vm1, %v807_v8  ;;  %795 = vmatmul.msk.bf16.vlgmr.msra.gmra.mxu1 %vm91_vm1, %v803_v9  ;;  %v232_v30 = vperm.slane %v181_v7, 7  ;;  %vm511_vm6 = vcmask 1045509   ;;  %vm514_vm7 = vcmask 1046534   ;;  %vm517_vm8 = vcmask 1047559  }
   0x8   :  { %814 = vset.pattern.permute.xlu2 %v185_v4 }
   0xc   :  { %202 = vperm.xlu1 %813, %v197_v11  }
  0x14   :  { %258 = vperm.xlu1 %813, %v253_v12  }
  0x15   :  { %794 = vmatmul.msk.bf16.gmra.mxu0 %vm91_vm1, %v802_v13 }
  0x16   :  { %798 = vmatmul.msk.bf16.gmra.mxu2 %vm91_vm1, %v806_v15 }
  0x17   :  { %195 = vperm.xlu0 %815, %v190_v14   ;;  %800 = vmatmul.msk.bf16.gmra.mxu3 %vm91_vm1, %v808_v16 }
  0x18   :  { %796 = vmatmul.msk.bf16.gmra.mxu1 %vm91_vm1, %v804_v17  ;;  %vm743_vm1 = vcmask 7168  }
  0x1c   :  { %265 = vperm.xlu1 %813, %v260_v18  }
  0x1e   :  { %188 = vperm.xlu2 %814, %v183_v20  }
  0x1f   :  { %251 = vperm.xlu0 %815, %v246_v19  }
  0x24   :  { %216 = vperm.xlu1 %813, %v211_v21  }
  0x26   :  { %209 = vperm.xlu2 %814, %v204_v23  }
  0x27   :  { %244 = vperm.xlu0 %815, %v239_v22  }
  0x2c   :  { %272 = vperm.xlu1 %813, %v267_v24  }
  0x2e   :  { %286 = vperm.xlu2 %814, %v281_v26  }
  0x2f   :  { %293 = vperm.xlu0 %815, %v288_v25  }
  0x34   :  { %223 = vperm.xlu1 %813, %v218_v27  }
  0x3c   :  { %279 = vperm.xlu1 %813, %v274_v28  }
  0x44   :  { %230 = vperm.xlu1 %813, %v225_v29  }
  0x4c   :  { %237 = vperm.xlu1 %813, %v232_v30  }
  0x76   :  { %v413_v32 = vpop.xlane.xlu0 %412 }
  0x77   :  { %v415_v45 = vmax.f32 %v413_v32, 1e-09 }
  0x79   :  { %v410_v34 = vpop.xlane.xlu2 %409 }
  0x7a   :  { %v414_v52 = vmax.f32 %v410_v34, 1e-09 }
  0x7e   :  { %v945_v31 = vpop.permute.xlu1 %202 }
  0x81   :  { %v189_v47 = vpop.permute.xlu2 %188 }
  0x82   :  { %v125_v35 = vpop.f32.mrf.mxu0 }
  0x83   :  { %v126_v36 = vadd.f32 %v950_v33, %v125_v35 }
  0x84   :  { %v135_v38 = vpop.f32.mrf.mxu1 }
  0x85   :  { %817 = vtanh.f32 %v126_v36  ;;  %v136_v41 = vadd.f32 %v950_v33, %v135_v38 }
  0x86   :  { %v953_v37 = vpop.permute.xlu1 %258 }
  0x87   :  { %819 = vtanh.f32 %v136_v41 }
  0x89   :  { %v196_v39 = vpop.permute.xlu0 %195  ;;  %v145_v40 = vpop.f32.mrf.mxu2 }
  0x8a   :  { %v155_v42 = vpop.f32.mrf.mxu3  ;;  %v127_v43 = vpop.f32.mrf.mxu0  ;;  %v146_v48 = vadd.f32 %v950_v33, %v145_v40 }
  0x8b   :  { %v818_v44 = vpop.eup %817  ;;  %v128_v46 = vadd.f32 %v950_v33, %v127_v43  ;;  %v156_v55 = vadd.f32 %v950_v33, %v155_v42  ;;  %v210_v40 = vpop.permute.xlu2 %209 }
  0x8c   :  { %v295_v49 = vmul.f32 %v818_v44, %v189_v47  ;;  %v137_v57 = vpop.f32.mrf.mxu1 }
  0x8d   :  { %821 = vtanh.f32 %v128_v46  ;;  %v820_v61 = vpop.eup %819  ;;  %v138_v20 = vadd.f32 %v950_v33, %v137_v57 }
  0x8e   :  { %v958_v50 = vpop.permute.xlu1 %265  ;;  %v311_v51 = vrot.slane %v295_v49, 4  ;;  %823 = vrcp.f32 %v415_v45 }
  0x8f   :  { %825 = vtanh.f32 %v146_v48 }
  0x90   :  { %v312_v54 = vadd.f32 %v311_v51, %v295_v49  ;;  %827 = vrcp.f32 %v414_v52 }
  0x91   :  { %v252_v53 = vpop.permute.xlu0 %251  ;;  %v147_v56 = vpop.f32.mrf.mxu2 }
  0x92   :  { %v148_v58 = vadd.f32 %v950_v33, %v147_v56  ;;  %v157_v59 = vpop.f32.mrf.mxu3  ;;  %v130_v60 = vpop.f32.mrf.mxu0  ;;  %v313_v0 = vrot.slane %v312_v54, 2 }
  0x93   :  { %v131_v62 = vadd.f32 %v950_v33, %v130_v60  ;;  %v822_v63 = vpop.eup %821  ;;  %v158_v46 = vadd.f32 %v950_v33, %v157_v59 }
  0x94   :  { %829 = vtanh.f32 %v148_v58  ;;  %v963_v1 = vpop.eup %823  ;;  %v296_v2 = vmul.f32 %v822_v63, %v196_v39  ;;  %v314_v7 = vadd.f32 %v313_v0, %v312_v54 }
  0x95   :  { %831 = vtanh.f32 %v156_v55  ;;  %v826_v4 = vpop.eup %825  ;;  %v427_v12 = vrot.slane %v963_v1, 1  ;;  %v428_v15 = vrot.slane %v963_v1, 2  ;;  %v430_v21 = vrot.slane %v963_v1, 4  ;;  %v140_v28 = vpop.f32.mrf.mxu1 }
  0x96   :  { %v217_v3 = vpop.permute.xlu1 %216  ;;  %833 = vtanh.f32 %v131_v62  ;;  %v317_v6 = vrot.slane %v296_v2, 4  ;;  %v965_v10 = vpop.eup %827  ;;  %v429_v22 = vrot.slane %v963_v1, 3  ;;  %v432_v27 = vrot.slane %v963_v1, 6 }
  0x97   :  { %v299_v5 = vmul.f32 %v820_v61, %v217_v3  ;;  %v315_v32 = vrot.slane %v314_v7, 1  ;;  %v420_v42 = vrot.slane %v965_v10, 1  ;;  %v423_v43 = vrot.slane %v965_v10, 4 }
  0x98   :  { %v318_v11 = vadd.f32 %v317_v6, %v296_v2  ;;  %v431_v60 = vrot.slane %v963_v1, 5  ;;  %v433_v61 = vrot.slane %v963_v1, 7  ;;  %v421_v62 = vrot.slane %v965_v10, 2 }
  0x99   :  { %v335_v8 = vrot.slane %v299_v5, 4  ;;  %v245_v9 = vpop.permute.xlu0 %244  ;;  %v150_v14 = vpop.f32.mrf.mxu2  ;;  %v316_v51 = vadd.f32 %v315_v32, %v314_v7  ;;  %v141_v2 = vadd.f32 %v950_v33, %v140_v28  ;;  %v422_v6 = vrot.slane %v965_v10, 3 }
  0x9a   :  { %v303_v13 = vmul.f32 %v826_v4, %v245_v9  ;;  %v830_v16 = vpop.eup %829  ;;  %v151_v17 = vadd.f32 %v950_v33, %v150_v14  ;;  %v160_v18 = vpop.f32.mrf.mxu3  ;;  %v319_v30 = vrot.slane %v318_v11, 2 }
  0x9b   :  { %v132_v19 = vpop.f32.mrf.mxu0  ;;  %v832_v23 = vpop.eup %831  ;;  %v304_v24 = vmul.f32 %v830_v16, %v252_v53  ;;  %v336_v25 = vadd.f32 %v335_v8, %v299_v5  ;;  %v161_v39 = vadd.f32 %v950_v33, %v160_v18  ;;  %v986_v4 = vmul.f32 %v965_v10, %v316_v51 }
  0x9c   :  { %v359_v26 = vrot.slane %v303_v13, 4  ;;  %v834_v29 = vpop.eup %833  ;;  %835 = vtanh.f32 %v151_v17  ;;  %v133_v34 = vadd.f32 %v950_v33, %v132_v19  ;;  %v320_v49 = vadd.f32 %v319_v30, %v318_v11 }
  0x9d   :  { %v365_v35 = vrot.slane %v304_v24, 4  ;;  %v297_v36 = vmul.f32 %v834_v29, %v945_v31  ;;  %837 = vtanh.f32 %v138_v20  ;;  %v337_v48 = vrot.slane %v336_v25, 2 }
  0x9e   :  { %v360_v38 = vadd.f32 %v359_v26, %v303_v13  ;;  %v273_v41 = vpop.permute.xlu1 %272  ;;  %839 = vtanh.f32 %v133_v34  ;;  %v321_v7 = vrot.slane %v320_v49, 1  ;;  %v142_v13 = vpop.f32.mrf.mxu1  ;;  %v424_v19 = vrot.slane %v965_v10, 5 }
  0x9f   :  { %v307_v44 = vmul.f32 %v832_v23, %v273_v41  ;;  %v366_v45 = vadd.f32 %v365_v35, %v304_v24  ;;  %v323_v47 = vrot.slane %v297_v36, 4  ;;  %841 = vtanh.f32 %v161_v39 }
  0xa0   :  { %v361_v54 = vrot.slane %v360_v38, 2  ;;  %v338_v63 = vadd.f32 %v337_v48, %v336_v25  ;;  %v287_v25 = vpop.permute.xlu2 %286  ;;  %v994_v26 = vmul.f32 %v986_v4, %v986_v4  ;;  %v143_v29 = vadd.f32 %v950_v33, %v142_v13 }
  0xa1   :  { %v383_v31 = vrot.slane %v307_v44, 4  ;;  %v367_v52 = vrot.slane %v366_v45, 2  ;;  %v324_v53 = vadd.f32 %v323_v47, %v297_v36  ;;  %v152_v55 = vpop.f32.mrf.mxu2  ;;  %v322_v30 = vadd.f32 %v321_v7, %v320_v49 }
  0xa2   :  { %v836_v56 = vpop.eup %835  ;;  %v153_v58 = vadd.f32 %v950_v33, %v152_v55  ;;  %v162_v0 = vpop.f32.mrf.mxu3  ;;  %v362_v9 = vadd.f32 %v361_v54, %v360_v38  ;;  %v339_v24 = vrot.slane %v338_v63, 1 }
  0xa3   :  { %v384_v57 = vadd.f32 %v383_v31, %v307_v44  ;;  %v368_v59 = vadd.f32 %v367_v52, %v366_v45  ;;  %v838_v3 = vpop.eup %837  ;;  %v305_v5 = vmul.f32 %v836_v56, %v953_v37  ;;  %v325_v8 = vrot.slane %v324_v53, 2 }
  0xa4   :  { %843 = vtanh.f32 %v153_v58  ;;  %v840_v14 = vpop.eup %839  ;;  %v163_v18 = vadd.f32 %v950_v33, %v162_v0  ;;  %v363_v34 = vrot.slane %v362_v9, 1  ;;  %v1002_v49 = vmul.f32 %v420_v42, %v322_v30 }
  0xa5   :  { %845 = vtanh.f32 %v158_v46  ;;  %v371_v16 = vrot.slane %v305_v5, 4  ;;  %v385_v17 = vrot.slane %v384_v57, 2  ;;  %v842_v20 = vpop.eup %841  ;;  %v369_v23 = vrot.slane %v368_v59, 1 }
  0xa6   :  { %v224_v11 = vpop.permute.xlu1 %223  ;;  %v298_v37 = vmul.f32 %v840_v14, %v210_v40  ;;  %847 = vtanh.f32 %v141_v2  ;;  %v326_v32 = vadd.f32 %v325_v8, %v324_v53  ;;  %v309_v41 = vmul.f32 %v842_v20, %v287_v25  ;;  %v294_v2 = vpop.permute.xlu0 %293 }
  0xa7   :  { %v372_v28 = vadd.f32 %v371_v16, %v305_v5  ;;  %849 = vtanh.f32 %v163_v18  ;;  %v386_v39 = vadd.f32 %v385_v17, %v384_v57  ;;  %v300_v44 = vmul.f32 %v838_v3, %v224_v11 }
  0xa8   :  { %v329_v35 = vrot.slane %v298_v37, 4  ;;  %v370_v45 = vadd.f32 %v369_v23, %v368_v59  ;;  %v997_v46 = vadd.f32 %v339_v24, %v338_v63  ;;  %v395_v31 = vrot.slane %v309_v41, 4 }
  0xa9   :  { %v373_v38 = vrot.slane %v372_v28, 2  ;;  %v341_v52 = vrot.slane %v300_v44, 4  ;;  %851 = vtanh.f32 %v143_v29  ;;  %v364_v53 = vadd.f32 %v363_v34, %v362_v9 }
  0xaa   :  { %v844_v36 = vpop.eup %843  ;;  %v330_v47 = vadd.f32 %v329_v35, %v298_v37  ;;  %v327_v58 = vrot.slane %v326_v32, 1  ;;  %v387_v63 = vrot.slane %v386_v39, 1  ;;  %v396_v0 = vadd.f32 %v395_v31, %v309_v41 }
  0xab   :  { %v846_v40 = vpop.eup %845  ;;  %v306_v48 = vmul.f32 %v844_v36, %v958_v50  ;;  %v374_v51 = vadd.f32 %v373_v38, %v372_v28  ;;  %v1006_v50 = vmul.f32 %v427_v12, %v370_v45  ;;  %v342_v9 = vadd.f32 %v341_v52, %v300_v44 }
  0xac   :  { %v848_v33 = vpop.eup %847  ;;  %v331_v54 = vrot.slane %v330_v47, 2  ;;  %v397_v11 = vrot.slane %v396_v0, 2  ;;  %v1009_v13 = vmul.f32 %v963_v1, %v364_v53  ;;  %v1013_v20 = vmul.f32 %v1002_v49, %v1002_v49 }
  0xad   :  { %v377_v55 = vrot.slane %v306_v48, 4  ;;  %v850_v57 = vpop.eup %849  ;;  %v375_v59 = vrot.slane %v374_v51, 1  ;;  %v388_v23 = vadd.f32 %v387_v63, %v386_v39  ;;  %v328_v37 = vadd.f32 %v327_v58, %v326_v32 }
  0xae   :  { %v280_v56 = vpop.permute.xlu1 %279  ;;  %v310_v5 = vmul.f32 %v850_v57, %v294_v2  ;;  %v332_v42 = vadd.f32 %v331_v54, %v330_v47  ;;  %v398_v24 = vadd.f32 %v397_v11, %v396_v0  ;;  %v475_v30 = vmul.f32 %v1006_v50, %v1006_v50 }
  0xaf   :  { %v378_v3 = vadd.f32 %v377_v55, %v306_v48  ;;  %v308_v7 = vmul.f32 %v846_v40, %v280_v56  ;;  %v376_v8 = vadd.f32 %v375_v59, %v374_v51  ;;  %v852_v18 = vpop.eup %851  ;;  %v343_v36 = vrot.slane %v342_v9, 2 }
  0xb0   :  { %v401_v16 = vrot.slane %v310_v5, 4  ;;  %v333_v34 = vrot.slane %v332_v42, 1  ;;  %v399_v35 = vrot.slane %v398_v24, 1  ;;  %v474_v38 = vmul.f32 %v1009_v13, %v1009_v13 }
  0xb1   :  { %v379_v14 = vrot.slane %v378_v3, 2  ;;  %v389_v17 = vrot.slane %v308_v7, 4  ;;  %v1017_v12 = vmul.f32 %v428_v15, %v376_v8  ;;  %v1025_v32 = vmul.f32 %v430_v21, %v388_v23 }
  0xb2   :  { %v402_v28 = vadd.f32 %v401_v16, %v310_v5  ;;  %v400_v39 = vadd.f32 %v399_v35, %v398_v24  ;;  %v1031_v48 = vmul.f32 %v421_v62, %v328_v37  ;;  %v334_v53 = vadd.f32 %v333_v34, %v332_v42 }
  0xb3   :  { %v380_v25 = vadd.f32 %v379_v14, %v378_v3  ;;  %v390_v29 = vadd.f32 %v389_v17, %v308_v7  ;;  %v476_v47 = vmul.f32 %v1017_v12, %v1017_v12  ;;  %v344_v54 = vadd.f32 %v343_v36, %v342_v9 }
  0xb4   :  { %v403_v44 = vrot.slane %v402_v28, 2  ;;  %v519_v56 = vrot.slane %v475_v30, 7  ;;  %v478_v62 = vmul.f32 %v1025_v32, %v1025_v32 }
  0xb5   :  { %v381_v41 = vrot.slane %v380_v25, 1  ;;  %v391_v40 = vrot.slane %v390_v29, 2  ;;  %v521_v63 = vrot.slane %v476_v47, 6 }
  0xb6   :  { %v231_v15 = vpop.permute.xlu1 %230  ;;  %v404_v31 = vadd.f32 %v403_v44, %v402_v28  ;;  %v520_v7 = vsel %vm499_vm2, %v519_v56, %v474_v38  ;;  %v525_v16 = vrot.slane %v478_v62, 4  ;;  %v498_v38 = vrot.slane %v1013_v20, 7 }
  0xb7   :  { %v301_v45 = vmul.f32 %v848_v33, %v231_v15  ;;  %v382_v51 = vadd.f32 %v381_v41, %v380_v25  ;;  %v392_v52 = vadd.f32 %v391_v40, %v390_v29  ;;  %v1039_v33 = vmul.f32 %v432_v27, %v400_v39 }
  0xb8   :  { %v405_v57 = vrot.slane %v404_v31, 1  ;;  %v345_v27 = vrot.slane %v344_v54, 1  ;;  %v522_v23 = vsel %vm502_vm3, %v521_v63, %v520_v7  ;;  %v1075_v41 = vmul.f32 %v423_v43, %v997_v46 }
  0xb9   :  { %v347_v55 = vrot.slane %v301_v45, 4  ;;  %v1035_v21 = vmul.f32 %v429_v22, %v382_v51  ;;  %v393_v58 = vrot.slane %v392_v52, 1  ;;  %v1047_v22 = vmul.f32 %v422_v6, %v334_v53 }
  0xba   :  { %v406_v0 = vadd.f32 %v405_v57, %v404_v31  ;;  %v480_v9 = vmul.f32 %v1039_v33, %v1039_v33  ;;  %v425_v44 = vrot.slane %v965_v10, 6  ;;  %v500_v43 = vsel %vm499_vm2, %v498_v38, %v994_v26 }
  0xbb   :  { %v348_v59 = vadd.f32 %v347_v55, %v301_v45  ;;  %v394_v2 = vadd.f32 %v393_v58, %v392_v52  ;;  %v477_v3 = vmul.f32 %v1035_v21, %v1035_v21  ;;  %v469_v30 = vmul.f32 %v1047_v22, %v1047_v22 }
  0xbc   :  { %v1056_v11 = vmul.f32 %v433_v61, %v406_v0  ;;  %v346_v61 = vadd.f32 %v345_v27, %v344_v54  ;;  %v529_v29 = vrot.slane %v480_v9, 2  ;;  %v470_v53 = vmul.f32 %v1075_v41, %v1075_v41 }
  0xbd   :  { %v349_v5 = vrot.slane %v348_v59, 2  ;;  %v1052_v8 = vmul.f32 %v431_v60, %v394_v2  ;;  %v523_v14 = vrot.slane %v477_v3, 5  ;;  %v504_v46 = vrot.slane %v469_v30, 5 }
  0xbe   :  { %v238_v42 = vpop.permute.xlu1 %237  ;;  %v481_v60 = vmul.f32 %v1056_v11, %v1056_v11  ;;  %v1081_v39 = vmul.f32 %v424_v19, %v346_v61  ;;  %v426_v58 = vrot.slane %v965_v10, 7 }
  0xbf   :  { %v350_v6 = vadd.f32 %v349_v5, %v348_v59  ;;  %v302_v17 = vmul.f32 %v852_v18, %v238_v42  ;;  %v479_v24 = vmul.f32 %v1052_v8, %v1052_v8  ;;  %v524_v1 = vsel %vm505_vm4, %v523_v14, %v522_v23 }
  0xc0   :  { %v468_v18 = vmul.f32 %v1031_v48, %v1031_v48  ;;  %v526_v36 = vsel %vm508_vm5, %v525_v16, %v524_v1  ;;  %v531_v15 = vrot.slane %v481_v60, 1  ;;  %v471_v19 = vmul.f32 %v1081_v39, %v1081_v39 }
  0xc1   :  { %v351_v37 = vrot.slane %v350_v6, 1  ;;  %v353_v25 = vrot.slane %v302_v17, 4  ;;  %v527_v28 = vrot.slane %v479_v24, 3  ;;  %v507_v59 = vrot.slane %v470_v53, 4 }
  0xc2   :  { %v501_v31 = vrot.slane %v468_v18, 6  ;;  %v510_v63 = vrot.slane %v471_v19, 3 }
  0xc3   :  { %v352_v34 = vadd.f32 %v351_v37, %v350_v6  ;;  %v354_v35 = vadd.f32 %v353_v25, %v302_v17  ;;  %v528_v40 = vsel %vm511_vm6, %v527_v28, %v526_v36 }
  0xc4   :  { %v530_v47 = vsel %vm514_vm7, %v529_v29, %v528_v40  ;;  %v503_v56 = vsel %vm502_vm3, %v501_v31, %v500_v43 }
  0xc5   :  { %v355_v45 = vrot.slane %v354_v35, 2  ;;  %v1084_v51 = vmul.f32 %v425_v44, %v352_v34  ;;  %v532_v20 = vsel %vm517_vm8, %v531_v15, %v530_v47  ;;  %v506_v62 = vsel %vm505_vm4, %v504_v46, %v503_v56 }
  0xc6   :  { %537 = vadd.xlane.f32.xlu2 %v532_v20  ;;  %v509_v0 = vsel %vm508_vm5, %v507_v59, %v506_v62 }
  0xc7   :  { %v356_v52 = vadd.f32 %v355_v45, %v354_v35  ;;  %v472_v55 = vmul.f32 %v1084_v51, %v1084_v51  ;;  %v512_v27 = vsel %vm511_vm6, %v510_v63, %v509_v0 }
  0xc9   :  { %v357_v54 = vrot.slane %v356_v52, 1  ;;  %v513_v2 = vrot.slane %v472_v55, 2 }
  0xcb   :  { %v358_v57 = vadd.f32 %v357_v54, %v356_v52  ;;  %v515_v7 = vsel %vm514_vm7, %v513_v2, %v512_v27 }
  0xcd   :  { %v1098_v26 = vmul.f32 %v426_v58, %v358_v57 }
  0xcf   :  { %v473_v3 = vmul.f32 %v1098_v26, %v1098_v26 }
  0xd1   :  { %v516_v5 = vrot.slane %v473_v3, 1 }
  0xd3   :  { %v518_v42 = vsel %vm517_vm8, %v516_v5, %v515_v7 }
  0xd4   :  { %535 = vadd.xlane.f32.xlu1 %v518_v42 }
 0x139   :  { %v538_v10 = vpop.xlane.xlu2 %537 }
 0x13a   :  { %853 = vrsqrt.f32 %v538_v10  ;;  %vm558_vm9 = vcmp.eq.f32.partialorder %v538_v10, inf  ;;  %v561_v1 = vand.u32 2147483648, %v538_v10  ;;  %vm560_vm10 = vcmp.eq.f32.partialorder %v538_v10, 0.0 }
 0x140   :  { %v854_v9 = vpop.eup %853 }
 0x141   :  { %v552_v14 = vmul.f32 %v854_v9, %v538_v10 }
 0x143   :  { %v553_v16 = vmul.f32 %v854_v9, %v552_v14 }
 0x145   :  { %v554_v6 = vmul.f32 0.5, %v553_v16 }
 0x147   :  { %v536_v17 = vpop.xlane.xlu1 %535  ;;  %v555_v23 = vsub.f32 1.5, %v554_v6 }
 0x148   :  { %855 = vrsqrt.f32 %v536_v17  ;;  %vm546_vm11 = vcmp.eq.f32.partialorder %v536_v17, inf  ;;  %vm548_vm12 = vcmp.eq.f32.partialorder %v536_v17, 0.0  ;;  %v549_v38 = vand.u32 2147483648, %v536_v17 }
 0x149   :  { %v556_v24 = vmul.f32 %v854_v9, %v555_v23 }
 0x14b   :  { %v557_v60 = vmul.f32 %v556_v24, %v538_v10 }
 0x14d   :  { %v559_v37 = vsel %vm558_vm9, %v538_v10, %v557_v60 }
 0x14e   :  { %v856_v61 = vpop.eup %855  ;;  %v562_v25 = vsel %vm560_vm10, %v561_v1, %v559_v37 }
 0x14f   :  { %v540_v28 = vmul.f32 %v856_v61, %v536_v17  ;;  %v564_v29 = vmax.f32 %v562_v25, 1e-12 }
 0x151   :  { %v541_v18 = vmul.f32 %v856_v61, %v540_v28  ;;  %857 = vrcp.f32 %v564_v29 }
 0x153   :  { %v542_v30 = vmul.f32 0.5, %v541_v18 }
 0x155   :  { %v543_v34 = vsub.f32 1.5, %v542_v30 }
 0x157   :  { %v544_v35 = vmul.f32 %v856_v61, %v543_v34  ;;  %v858_v36 = vpop.eup %857 }
 0x158   :  { %v576_v40 = vrot.slane %v858_v36, 1  ;;  %v577_v15 = vrot.slane %v858_v36, 2  ;;  %v578_v45 = vrot.slane %v858_v36, 3  ;;  %v579_v47 = vrot.slane %v858_v36, 4 }
 0x159   :  { %v545_v44 = vmul.f32 %v544_v35, %v536_v17  ;;  %v580_v20 = vrot.slane %v858_v36, 5  ;;  %v581_v31 = vrot.slane %v858_v36, 6  ;;  %v582_v52 = vrot.slane %v858_v36, 7 }
 0x15a   :  { %v607_v46 = vmul.f32 %v858_v36, %v1009_v13  ;;  %v608_v53 = vmul.f32 %v576_v40, %v1006_v50  ;;  %v1109_v54 = vmul.f32 %v577_v15, %v1017_v12  ;;  %v1112_v55 = vmul.f32 %v578_v45, %v1035_v21 }
 0x15b   :  { %v547_v43 = vsel %vm546_vm11, %v536_v17, %v545_v44  ;;  %v1115_v56 = vmul.f32 %v579_v47, %v1025_v32  ;;  %v1118_v57 = vmul.f32 %v580_v20, %v1052_v8  ;;  %v1121_v62 = vmul.f32 %v581_v31, %v1039_v33 }
 0x15c   :  { %v550_v19 = vsel %vm548_vm12, %v549_v38, %v547_v43  ;;  %v1124_v13 = vmul.f32 %v582_v52, %v1056_v11  ;;  %v695_v50 = vmul.f32 %v608_v53, %v608_v53  ;;  %v696_v12 = vmul.f32 %v1109_v54, %v1109_v54 }
 0x15d   :  { %v563_v58 = vmax.f32 %v550_v19, 1e-12  ;;  %v697_v21 = vmul.f32 %v1112_v55, %v1112_v55  ;;  %v698_v32 = vmul.f32 %v1115_v56, %v1115_v56  ;;  %v694_v8 = vmul.f32 %v607_v46, %v607_v46 }
 0x15e   :  { %v699_v59 = vmul.f32 %v1118_v57, %v1118_v57  ;;  %v710_v33 = vrot.slane %v695_v50, 7  ;;  %v712_v63 = vrot.slane %v696_v12, 6  ;;  %v700_v11 = vmul.f32 %v1121_v62, %v1121_v62 }
 0x15f   :  { %859 = vrcp.f32 %v563_v58  ;;  %v701_v0 = vmul.f32 %v1124_v13, %v1124_v13  ;;  %v714_v3 = vrot.slane %v697_v21, 5  ;;  %v716_v5 = vrot.slane %v698_v32, 4 }
 0x160   :  { %v711_v2 = vsel %vm499_vm2, %v710_v33, %v694_v8  ;;  %v718_v42 = vrot.slane %v699_v59, 3  ;;  %v720_v14 = vrot.slane %v700_v11, 2 }
 0x161   :  { %v713_v27 = vsel %vm502_vm3, %v712_v63, %v711_v2  ;;  %v722_v16 = vrot.slane %v701_v0, 1 }
 0x162   :  { %v715_v7 = vsel %vm505_vm4, %v714_v3, %v713_v27 }
 0x163   :  { %v717_v9 = vsel %vm508_vm5, %v716_v5, %v715_v7 }
 0x164   :  { %v719_v6 = vsel %vm511_vm6, %v718_v42, %v717_v9 }
 0x165   :  { %v860_v10 = vpop.eup %859  ;;  %v721_v60 = vsel %vm514_vm7, %v720_v14, %v719_v6 }
 0x166   :  { %v569_v17 = vrot.slane %v860_v10, 1  ;;  %v570_v23 = vrot.slane %v860_v10, 2  ;;  %v571_v24 = vrot.slane %v860_v10, 3  ;;  %v572_v1 = vrot.slane %v860_v10, 4 }
 0x167   :  { %v573_v61 = vrot.slane %v860_v10, 5  ;;  %v574_v37 = vrot.slane %v860_v10, 6  ;;  %v723_v25 = vsel %vm517_vm8, %v722_v16, %v721_v60  ;;  %v575_v28 = vrot.slane %v860_v10, 7 }
 0x168   :  { %v599_v29 = vmul.f32 %v860_v10, %v986_v4  ;;  %v600_v18 = vmul.f32 %v569_v17, %v1002_v49  ;;  %725 = vadd.xlane.f32.xlu1 %v723_v25  ;;  %v601_v30 = vmul.f32 %v570_v23, %v1031_v48  ;;  %v602_v34 = vmul.f32 %v571_v24, %v1047_v22 }
 0x169   :  { %v603_v35 = vmul.f32 %v572_v1, %v1075_v41  ;;  %v604_v36 = vmul.f32 %v573_v61, %v1081_v39  ;;  %v605_v38 = vmul.f32 %v574_v37, %v1084_v51  ;;  %v606_v44 = vmul.f32 %v575_v28, %v1098_v26 }
 0x16a   :  { %v649_v40 = vmul.f32 %v600_v18, %v600_v18  ;;  %v650_v15 = vmul.f32 %v601_v30, %v601_v30  ;;  %v651_v45 = vmul.f32 %v602_v34, %v602_v34  ;;  %v648_v4 = vmul.f32 %v599_v29, %v599_v29 }
 0x16b   :  { %v652_v47 = vmul.f32 %v603_v35, %v603_v35  ;;  %v653_v20 = vmul.f32 %v604_v36, %v604_v36  ;;  %v654_v49 = vmul.f32 %v605_v38, %v605_v38  ;;  %v655_v52 = vmul.f32 %v606_v44, %v606_v44 }
 0x16c   :  { %v664_v31 = vrot.slane %v649_v40, 7  ;;  %v666_v48 = vrot.slane %v650_v15, 6  ;;  %v668_v43 = vrot.slane %v651_v45, 5  ;;  %v615_v41 = vmul.f32 %v607_v46, %v599_v29 }
 0x16d   :  { %v616_v19 = vmul.f32 %v608_v53, %v600_v18  ;;  %v670_v51 = vrot.slane %v652_v47, 4  ;;  %v617_v26 = vmul.f32 %v1109_v54, %v601_v30  ;;  %v618_v58 = vmul.f32 %v1112_v55, %v602_v34 }
 0x16e   :  { %v665_v22 = vsel %vm499_vm2, %v664_v31, %v648_v4  ;;  %v672_v12 = vrot.slane %v653_v20, 3  ;;  %v674_v21 = vrot.slane %v654_v49, 2  ;;  %v619_v32 = vmul.f32 %v1115_v56, %v603_v35  ;;  %v745_v49 = vld [vmem:[%s1186_s2] sm:$0xff] }
 0x16f   :  { %v667_v39 = vsel %vm502_vm3, %v666_v48, %v665_v22  ;;  %v620_v59 = vmul.f32 %v1118_v57, %v604_v36  ;;  %v631_v33 = vrot.slane %v616_v19, 7  ;;  %v633_v46 = vrot.slane %v617_v26, 6 }
 0x170   :  { %v669_v50 = vsel %vm505_vm4, %v668_v43, %v667_v39  ;;  %v676_v63 = vrot.slane %v655_v52, 1  ;;  %v621_v11 = vmul.f32 %v1121_v62, %v605_v38  ;;  %v622_v55 = vmul.f32 %v1124_v13, %v606_v44 }
 0x171   :  { %v671_v8 = vsel %vm508_vm5, %v670_v51, %v669_v50  ;;  %v632_v0 = vsel %vm499_vm2, %v631_v33, %v615_v41  ;;  %v635_v2 = vrot.slane %v618_v58, 5  ;;  %v637_v27 = vrot.slane %v619_v32, 4 }
 0x172   :  { %v673_v53 = vsel %vm511_vm6, %v672_v12, %v671_v8  ;;  %v634_v3 = vsel %vm502_vm3, %v633_v46, %v632_v0  ;;  %v639_v5 = vrot.slane %v620_v59, 3  ;;  %v641_v42 = vrot.slane %v621_v11, 2 }
 0x173   :  { %v675_v54 = vsel %vm514_vm7, %v674_v21, %v673_v53  ;;  %v636_v57 = vsel %vm505_vm4, %v635_v2, %v634_v3  ;;  %v643_v10 = vrot.slane %v622_v55, 1 }
 0x174   :  { %v677_v56 = vsel %vm517_vm8, %v676_v63, %v675_v54  ;;  %v638_v7 = vsel %vm508_vm5, %v637_v27, %v636_v57 }
 0x175   :  { %679 = vadd.xlane.f32.xlu0 %v677_v56  ;;  %v640_v62 = vsel %vm511_vm6, %v639_v5, %v638_v7 }
 0x176   :  { %v642_v13 = vsel %vm514_vm7, %v641_v42, %v640_v62 }
 0x177   :  { %v644_v9 = vsel %vm517_vm8, %v643_v10, %v642_v13 }
 0x178   :  { %646 = vadd.xlane.f32.xlu1 %v644_v9 }
 0x1db   :  { %v726_v14 = vpop.xlane.xlu1 %725 }
 0x1dc   :  { %861 = vrsqrt.f32 %v726_v14  ;;  %vm734_vm13 = vcmp.eq.f32.partialorder %v726_v14, inf  ;;  %v737_v35 = vand.u32 2147483648, %v726_v14  ;;  %vm736_vm14 = vcmp.eq.f32.partialorder %v726_v14, 0.0 }
 0x1e2   :  { %v862_v16 = vpop.eup %861 }
 0x1e3   :  { %v728_v6 = vmul.f32 %v862_v16, %v726_v14 }
 0x1e5   :  { %v729_v17 = vmul.f32 %v862_v16, %v728_v6 }
 0x1e7   :  { %v730_v23 = vmul.f32 0.5, %v729_v17 }
 0x1e8   :  { %v680_v24 = vpop.xlane.xlu0 %679 }
 0x1e9   :  { %863 = vrsqrt.f32 %v680_v24  ;;  %v731_v60 = vsub.f32 1.5, %v730_v23  ;;  %vm688_vm15 = vcmp.eq.f32.partialorder %v680_v24, inf  ;;  %v691_v38 = vand.u32 2147483648, %v680_v24 }
 0x1ea   :  { %vm690_vm0 = vcmp.eq.f32.partialorder %v680_v24, 0.0 }
 0x1eb   :  { %v732_v61 = vmul.f32 %v862_v16, %v731_v60  ;;  %v647_v31 = vpop.xlane.xlu1 %646 }
 0x1ed   :  { %v733_v28 = vmul.f32 %v732_v61, %v726_v14 }
 0x1ef   :  { %v864_v1 = vpop.eup %863  ;;  %v735_v34 = vsel %vm734_vm13, %v726_v14, %v733_v28 }
 0x1f0   :  { %v682_v37 = vmul.f32 %v864_v1, %v680_v24  ;;  %v738_v44 = vsel %vm736_vm14, %v737_v35, %v735_v34 }
 0x1f1   :  { %v739_v47 = vmax.f32 %v738_v44, 1e-08 }
 0x1f2   :  { %v683_v25 = vmul.f32 %v864_v1, %v682_v37 }
 0x1f4   :  { %v684_v29 = vmul.f32 0.5, %v683_v25 }
 0x1f6   :  { %v685_v18 = vsub.f32 1.5, %v684_v29 }
 0x1f8   :  { %v686_v30 = vmul.f32 %v864_v1, %v685_v18 }
 0x1fa   :  { %v687_v36 = vmul.f32 %v686_v30, %v680_v24 }
 0x1fc   :  { %v689_v40 = vsel %vm688_vm15, %v680_v24, %v687_v36 }
 0x1fd   :  { %v692_v15 = vsel %vm690_vm0, %v691_v38, %v689_v40 }
 0x1fe   :  { %v693_v45 = vmax.f32 %v692_v15, 1e-08 }
 0x200   :  { %v740_v4 = vmul.f32 %v739_v47, %v693_v45 }
 0x202   :  { %865 = vrcp.f32 %v740_v4 }
 0x208   :  { %v866_v20 = vpop.eup %865 }
 0x209   :  { %v742_v52 = vmul.f32 %v866_v20, %v647_v31 }
 0x20b   :  { %744 = vst.msk [vmem:[%s1187_s5] sm:$0xff] %vm743_vm1, %v742_v52  ;;  %v746_v48 = vsub.f32 %v742_v52, %v745_v49 }
 0x20d   :  { %v747_v22 = vmul.f32 %v746_v48, %v746_v48 }
 0x20f   :  { %748 = vst.msk [vmem:[%s1188_s6] sm:$0xff] %vm743_vm1, %v747_v22 }

</bundles_post_ra>
